<compile_context>
chip_gen: v5e
topology: v5e:2x2
jax: 0.10.0
libtpu: 0.0.40
codegen_flags: <defaults>
</compile_context>

<pallas_src>
import numpy as np
import jax
import jax.numpy as jnp
from jax.experimental import pallas as pl
from jax.experimental.pallas import tpu as pltpu

# ---- static configuration -----------------------------------------------------
N, H, W = 2, 8, 8
C_OUT = 4
EXPANSION = 4
C_IN = C_OUT * EXPANSION          # 16 (must equal C_OUT * expansion for residual)
M = N * H * W                     # 128 flattened batch*spatial positions (lane axis)
EPS = 1e-5                        # PyTorch BatchNorm2d default
K2 = 40                           # im2col K padded from 9*C_OUT=36 to 40

# packed-parameter layout: one (C_IN + 8, 128) f32 tile
_W1 = 0                           # cols [ 0,16), rows [0,4)  : conv1 weight^T (C_OUT, C_IN)
_W2 = _W1 + C_IN                  # cols [16,56), rows [0,4)  : conv2 weight^T padded (C_OUT, 40)
_W3 = _W2 + K2                    # cols [56,60), rows [0,16) : conv3 weight^T (C_IN, C_OUT)
_BN = _W3 + C_OUT                 # cols [60,66)              : g1,be1,g2,be2,g3,be3 (channel on rows)
_MASK_ROW = C_IN                  # rows [16,24)              : boundary masks of the 8 off-center taps
P_ROWS = C_IN + 8                 # 24
P_COLS = 128                      # lane-dense parameter tile

_TAP_OFFSETS = [(ky - 1, kx - 1) for ky in range(3) for kx in range(3)]


def _bn_relu(h, c, gamma, beta, relu=True):
    """Training-mode BN over the lane (N*H*W) axis; sum & sum-of-squares fused
    into a single cross-lane reduction; biased variance with a >=0 guard."""
    stacked = jnp.concatenate([h, h * h], axis=0)            # (2c, M)
    s = jnp.sum(stacked, axis=1, keepdims=True) * (1.0 / M)  # one XLU reduce
    mean, ex2 = s[0:c], s[c:2 * c]
    var = jnp.maximum(ex2 - mean * mean, 0.0)
    y = (h - mean) * jax.lax.rsqrt(var + EPS) * gamma + beta
    return jnp.maximum(y, 0.0) if relu else y


def bottleneck_kernel(x_ref, p_ref, o_ref):
    x = x_ref[...]                                                  # (C_IN, M) channel-major

    # ---- unpack the consolidated parameter tile (static slices) -------------
    w1t = p_ref[0:C_OUT, _W1:_W1 + C_IN]                            # (C_OUT, C_IN)
    w2t = p_ref[0:C_OUT, _W2:_W2 + K2]                              # (C_OUT, 40), cols 36..39 zero
    w3t = p_ref[0:C_IN, _W3:_W3 + C_OUT]                            # (C_IN, C_OUT)
    g1, be1 = p_ref[0:C_OUT, _BN + 0:_BN + 1], p_ref[0:C_OUT, _BN + 1:_BN + 2]
    g2, be2 = p_ref[0:C_OUT, _BN + 2:_BN + 3], p_ref[0:C_OUT, _BN + 3:_BN + 4]
    g3, be3 = p_ref[0:C_IN, _BN + 4:_BN + 5], p_ref[0:C_IN, _BN + 5:_BN + 6]

    # ---- conv1 (1x1) + bn1 + relu  (conv bias cancels through training BN) --
    h = jnp.dot(w1t, x, preferred_element_type=jnp.float32)         # (C_OUT, M)
    h = _bn_relu(h, C_OUT, g1, be1)

    # ---- conv2 (3x3, stride 1, pad 1) ----------------------------------------
    # 8 lane-rolled copies of h, masked with precomputed boundary masks, fused
    # with the center tap + one zero pad tap into a single K=40 im2col matmul.
    taps = []
    mask_idx = 0
    for (dy, dx) in _TAP_OFFSETS:
        d = dy * W + dx
        if d == 0:
            taps.append(h)
            continue
        shifted = pltpu.roll(h, shift=(-d) % M, axis=1)             # out[:, m] = h[:, (m + d) % M]
        mask = p_ref[_MASK_ROW + mask_idx:_MASK_ROW + mask_idx + 1, :]   # (1, M) precomputed
        taps.append(shifted * mask)
        mask_idx += 1
    taps.append(jnp.zeros((C_OUT, M), jnp.float32))                 # pad K: 36 -> 40
    im2col = jnp.concatenate(taps, axis=0)                          # (40, M)
    h = jnp.dot(w2t, im2col, preferred_element_type=jnp.float32)    # (C_OUT, M)
    h = _bn_relu(h, C_OUT, g2, be2)

    # ---- conv3 (1x1) + bn3 + residual + relu ---------------------------------
    h = jnp.dot(w3t, h, preferred_element_type=jnp.float32)         # (C_IN, M)
    h = _bn_relu(h, C_IN, g3, be3, relu=False)
    o_ref[...] = jnp.maximum(h + x, 0.0)                            # (16, 128): lane-dense store


# ---- one-time (host-side, numpy) parameter packing ----------------------------
def _tap_masks():
    m = np.arange(M)
    y = (m // W) % H
    xx = m % W
    rows = []
    for (dy, dx) in _TAP_OFFSETS:
        if dy == 0 and dx == 0:
            continue
        valid = ((xx + dx >= 0) & (xx + dx < W) & (y + dy >= 0) & (y + dy < H))
        rows.append(valid.astype(np.float32))
    return np.stack(rows)                                           # (8, 128)


def pack_params(p):
    """Pack weights + BN affine params + boundary masks into one (24,128) tile.
    Call ONCE; the result is reused across forward calls."""
    P = np.zeros((P_ROWS, P_COLS), np.float32)
    P[:C_OUT, _W1:_W1 + C_IN] = np.asarray(p["w1"]).T               # (C_OUT, C_IN)
    P[:C_OUT, _W2:_W2 + 9 * C_OUT] = np.asarray(p["w2"]).reshape(9 * C_OUT, C_OUT).T
    P[:C_IN, _W3:_W3 + C_OUT] = np.asarray(p["w3"]).T               # (C_IN, C_OUT)
    P[:C_OUT, _BN + 0] = np.asarray(p["g1"])
    P[:C_OUT, _BN + 1] = np.asarray(p["be1"])
    P[:C_OUT, _BN + 2] = np.asarray(p["g2"])
    P[:C_OUT, _BN + 3] = np.asarray(p["be2"])
    P[:C_IN, _BN + 4] = np.asarray(p["g3"])
    P[:C_IN, _BN + 5] = np.asarray(p["be3"])
    P[_MASK_ROW:_MASK_ROW + 8, :] = _tap_masks()
    return jnp.asarray(P)


def bottleneck_block(x_nchw, packed):
    """NCHW in -> NCHW out, matching the PyTorch block.forward()."""
    # channel-major (C_IN, M): M = N*H*W = 128 sits on the 128-lane axis.
    x_cm = jnp.transpose(x_nchw, (1, 0, 2, 3)).reshape(C_IN, M).astype(jnp.float32)
    out = pl.pallas_call(
        bottleneck_kernel,
        out_shape=jax.ShapeDtypeStruct((C_IN, M), jnp.float32),
        in_specs=[pl.BlockSpec(memory_space=pltpu.MemorySpace.VMEM)] * 2,
        out_specs=pl.BlockSpec(memory_space=pltpu.MemorySpace.VMEM),
    )(x_cm, packed)
    return jnp.transpose(out.reshape(C_IN, N, H, W), (1, 0, 2, 3))


def init_params(key):
    """Deterministic synthetic parameters (conv weights random, BN gamma=1/beta=0)."""
    ks = jax.random.split(key, 6)
    return dict(
        w1=jax.random.normal(ks[0], (C_IN, C_OUT), jnp.float32) * 0.2,        # (Cin, Cout)
        b1=jax.random.normal(ks[1], (C_OUT,), jnp.float32) * 0.05,
        w2=jax.random.normal(ks[2], (3, 3, C_OUT, C_OUT), jnp.float32) * 0.2,  # (ky,kx,Cin,Cout)
        b2=jax.random.normal(ks[3], (C_OUT,), jnp.float32) * 0.05,
        w3=jax.random.normal(ks[4], (C_OUT, C_IN), jnp.float32) * 0.2,
        b3=jax.random.normal(ks[5], (C_IN,), jnp.float32) * 0.05,
        g1=jnp.ones((C_OUT,), jnp.float32), be1=jnp.zeros((C_OUT,), jnp.float32),
        g2=jnp.ones((C_OUT,), jnp.float32), be2=jnp.zeros((C_OUT,), jnp.float32),
        g3=jnp.ones((C_IN,), jnp.float32), be3=jnp.zeros((C_IN,), jnp.float32),
    )


def reference(x_nchw, p):
    """Pure-JAX reference of the PyTorch forward (training-mode BN, with conv biases)."""
    x = jnp.transpose(x_nchw, (0, 2, 3, 1)).astype(jnp.float32)     # NHWC

    def bn(h, g, b):
        mean = jnp.mean(h, axis=(0, 1, 2), keepdims=True)
        var = jnp.mean((h - mean) ** 2, axis=(0, 1, 2), keepdims=True)
        return (h - mean) / jnp.sqrt(var + EPS) * g + b

    h = jnp.einsum("nhwc,co->nhwo", x, p["w1"]) + p["b1"]
    h = jax.nn.relu(bn(h, p["g1"], p["be1"]))

    hp = jnp.pad(h, ((0, 0), (1, 1), (1, 1), (0, 0)))
    acc = jnp.zeros_like(h)
    for ky in range(3):
        for kx in range(3):
            acc = acc + jnp.einsum("nhwc,co->nhwo",
                                   hp[:, ky:ky + H, kx:kx + W, :], p["w2"][ky, kx])
    h = jax.nn.relu(bn(acc + p["b2"], p["g2"], p["be2"]))

    h = jnp.einsum("nhwc,co->nhwo", h, p["w3"]) + p["b3"]
    h = jax.nn.relu(bn(h, p["g3"], p["be3"]) + x)
    return jnp.transpose(h, (0, 3, 1, 2))


if __name__ == "__main__":
    key = jax.random.PRNGKey(0)
    kx, kp = jax.random.split(key)
    x = jax.random.normal(kx, (N, C_IN, H, W), jnp.float32)   # NCHW, like PyTorch
    params = init_params(kp)

    packed = pack_params(params)                  # packed ONCE, outside the per-call path
    fwd = jax.jit(bottleneck_block)

    out = jax.block_until_ready(fwd(x, packed))

    ref = reference(x, params)
    assert out.shape == (N, C_IN, H, W)
    err = float(jnp.max(jnp.abs(out - ref)))
    assert err < 1e-3, err
    print("KERNEL_OK")
</pallas_src>

<mosaic_0001>
module attributes {stable_mosaic.version = 11 : i64} {
  func.func @bottleneck_kernel(%arg0: memref<16x128xf32, #tpu.memory_space<vmem>>, %arg1: memref<24x128xf32, #tpu.memory_space<vmem>>, %arg2: memref<16x128xf32, #tpu.memory_space<vmem>>) attributes {dimension_semantics = [], scalar_prefetch = 0 : i64, scratch_operands = 0 : i64, tpu.core_type = #tpu.core_type<tc>} {
    %c0 = arith.constant 0 : index
    %c0_0 = arith.constant 0 : index
    %0 = vector.load %arg0[%c0, %c0_0] : memref<16x128xf32, #tpu.memory_space<vmem>>, vector<16x128xf32>
    %c0_1 = arith.constant 0 : index
    %c0_2 = arith.constant 0 : index
    %1 = vector.load %arg1[%c0_1, %c0_2] : memref<24x128xf32, #tpu.memory_space<vmem>>, vector<4x16xf32>
    %c0_3 = arith.constant 0 : index
    %c16 = arith.constant 16 : index
    %2 = vector.load %arg1[%c0_3, %c16] : memref<24x128xf32, #tpu.memory_space<vmem>>, vector<4x40xf32>
    %c0_4 = arith.constant 0 : index
    %c56 = arith.constant 56 : index
    %3 = vector.load %arg1[%c0_4, %c56] : memref<24x128xf32, #tpu.memory_space<vmem>>, vector<16x4xf32>
    %c0_5 = arith.constant 0 : index
    %c60 = arith.constant 60 : index
    %4 = vector.load %arg1[%c0_5, %c60] : memref<24x128xf32, #tpu.memory_space<vmem>>, vector<4x1xf32>
    %c0_6 = arith.constant 0 : index
    %c61 = arith.constant 61 : index
    %5 = vector.load %arg1[%c0_6, %c61] : memref<24x128xf32, #tpu.memory_space<vmem>>, vector<4x1xf32>
    %c0_7 = arith.constant 0 : index
    %c62 = arith.constant 62 : index
    %6 = vector.load %arg1[%c0_7, %c62] : memref<24x128xf32, #tpu.memory_space<vmem>>, vector<4x1xf32>
    %c0_8 = arith.constant 0 : index
    %c63 = arith.constant 63 : index
    %7 = vector.load %arg1[%c0_8, %c63] : memref<24x128xf32, #tpu.memory_space<vmem>>, vector<4x1xf32>
    %c0_9 = arith.constant 0 : index
    %c64 = arith.constant 64 : index
    %8 = vector.load %arg1[%c0_9, %c64] : memref<24x128xf32, #tpu.memory_space<vmem>>, vector<16x1xf32>
    %c0_10 = arith.constant 0 : index
    %c65 = arith.constant 65 : index
    %9 = vector.load %arg1[%c0_10, %c65] : memref<24x128xf32, #tpu.memory_space<vmem>>, vector<16x1xf32>
    %cst = arith.constant dense<0.000000e+00> : vector<4x128xf32>
    %10 = tpu.matmul %1, %0, %cst {dimension_numbers = #tpu.dot_dimension_numbers<[1], [0], [0], [1], [0, 0, 1, 1], [], []>} : vector<4x16xf32>, vector<16x128xf32>, vector<4x128xf32> -> vector<4x128xf32>
    %11 = arith.mulf %10, %10 : vector<4x128xf32>
    %12 = tpu.concatenate %10, %11 in 0 : vector<4x128xf32>, vector<4x128xf32> -> vector<8x128xf32>
    %cst_11 = arith.constant dense<0.000000e+00> : vector<8xf32>
    %13 = vector.multi_reduction <add>, %12, %cst_11 [1] : vector<8x128xf32> to vector<8xf32>
    %14 = vector.shape_cast %13 : vector<8xf32> to vector<8x1xf32>
    %cst_12 = arith.constant 7.812500e-03 : f32
    %15 = vector.broadcast %cst_12 : f32 to vector<8x1xf32>
    %16 = arith.mulf %14, %15 : vector<8x1xf32>
    %17 = vector.extract_strided_slice %16 {offsets = [0, 0], sizes = [4, 1], strides = [1, 1]} : vector<8x1xf32> to vector<4x1xf32>
    %18 = vector.extract_strided_slice %16 {offsets = [4, 0], sizes = [4, 1], strides = [1, 1]} : vector<8x1xf32> to vector<4x1xf32>
    %19 = arith.mulf %17, %17 : vector<4x1xf32>
    %20 = arith.subf %18, %19 : vector<4x1xf32>
    %cst_13 = arith.constant 0.000000e+00 : f32
    %21 = vector.broadcast %cst_13 : f32 to vector<4x1xf32>
    %22 = arith.maximumf %20, %21 : vector<4x1xf32>
    %23 = vector.broadcast %17 : vector<4x1xf32> to vector<4x128xf32>
    %24 = arith.subf %10, %23 : vector<4x128xf32>
    %cst_14 = arith.constant 9.99999974E-6 : f32
    %25 = vector.broadcast %cst_14 : f32 to vector<4x1xf32>
    %26 = arith.addf %22, %25 : vector<4x1xf32>
    %27 = math.rsqrt %26 : vector<4x1xf32>
    %28 = vector.broadcast %27 : vector<4x1xf32> to vector<4x128xf32>
    %29 = arith.mulf %24, %28 : vector<4x128xf32>
    %30 = vector.broadcast %4 : vector<4x1xf32> to vector<4x128xf32>
    %31 = arith.mulf %29, %30 : vector<4x128xf32>
    %32 = vector.broadcast %5 : vector<4x1xf32> to vector<4x128xf32>
    %33 = arith.addf %31, %32 : vector<4x128xf32>
    %cst_15 = arith.constant 0.000000e+00 : f32
    %34 = vector.broadcast %cst_15 : f32 to vector<4x128xf32>
    %35 = arith.maximumf %33, %34 : vector<4x128xf32>
    %c9_i32 = arith.constant 9 : i32
    %36 = tpu.dynamic_rotate %35 by %c9_i32 dim 1 : vector<4x128xf32>, i32 -> vector<4x128xf32>
    %c16_16 = arith.constant 16 : index
    %c0_17 = arith.constant 0 : index
    %37 = vector.load %arg1[%c16_16, %c0_17] : memref<24x128xf32, #tpu.memory_space<vmem>>, vector<1x128xf32>
    %38 = vector.broadcast %37 : vector<1x128xf32> to vector<4x128xf32>
    %39 = arith.mulf %36, %38 : vector<4x128xf32>
    %c8_i32 = arith.constant 8 : i32
    %40 = tpu.dynamic_rotate %35 by %c8_i32 dim 1 : vector<4x128xf32>, i32 -> vector<4x128xf32>
    %c17 = arith.constant 17 : index
    %c0_18 = arith.constant 0 : index
    %41 = vector.load %arg1[%c17, %c0_18] : memref<24x128xf32, #tpu.memory_space<vmem>>, vector<1x128xf32>
    %42 = vector.broadcast %41 : vector<1x128xf32> to vector<4x128xf32>
    %43 = arith.mulf %40, %42 : vector<4x128xf32>
    %c7_i32 = arith.constant 7 : i32
    %44 = tpu.dynamic_rotate %35 by %c7_i32 dim 1 : vector<4x128xf32>, i32 -> vector<4x128xf32>
    %c18 = arith.constant 18 : index
    %c0_19 = arith.constant 0 : index
    %45 = vector.load %arg1[%c18, %c0_19] : memref<24x128xf32, #tpu.memory_space<vmem>>, vector<1x128xf32>
    %46 = vector.broadcast %45 : vector<1x128xf32> to vector<4x128xf32>
    %47 = arith.mulf %44, %46 : vector<4x128xf32>
    %c1_i32 = arith.constant 1 : i32
    %48 = tpu.dynamic_rotate %35 by %c1_i32 dim 1 : vector<4x128xf32>, i32 -> vector<4x128xf32>
    %c19 = arith.constant 19 : index
    %c0_20 = arith.constant 0 : index
    %49 = vector.load %arg1[%c19, %c0_20] : memref<24x128xf32, #tpu.memory_space<vmem>>, vector<1x128xf32>
    %50 = vector.broadcast %49 : vector<1x128xf32> to vector<4x128xf32>
    %51 = arith.mulf %48, %50 : vector<4x128xf32>
    %c127_i32 = arith.constant 127 : i32
    %52 = tpu.dynamic_rotate %35 by %c127_i32 dim 1 : vector<4x128xf32>, i32 -> vector<4x128xf32>
    %c20 = arith.constant 20 : index
    %c0_21 = arith.constant 0 : index
    %53 = vector.load %arg1[%c20, %c0_21] : memref<24x128xf32, #tpu.memory_space<vmem>>, vector<1x128xf32>
    %54 = vector.broadcast %53 : vector<1x128xf32> to vector<4x128xf32>
    %55 = arith.mulf %52, %54 : vector<4x128xf32>
    %c121_i32 = arith.constant 121 : i32
    %56 = tpu.dynamic_rotate %35 by %c121_i32 dim 1 : vector<4x128xf32>, i32 -> vector<4x128xf32>
    %c21 = arith.constant 21 : index
    %c0_22 = arith.constant 0 : index
    %57 = vector.load %arg1[%c21, %c0_22] : memref<24x128xf32, #tpu.memory_space<vmem>>, vector<1x128xf32>
    %58 = vector.broadcast %57 : vector<1x128xf32> to vector<4x128xf32>
    %59 = arith.mulf %56, %58 : vector<4x128xf32>
    %c120_i32 = arith.constant 120 : i32
    %60 = tpu.dynamic_rotate %35 by %c120_i32 dim 1 : vector<4x128xf32>, i32 -> vector<4x128xf32>
    %c22 = arith.constant 22 : index
    %c0_23 = arith.constant 0 : index
    %61 = vector.load %arg1[%c22, %c0_23] : memref<24x128xf32, #tpu.memory_space<vmem>>, vector<1x128xf32>
    %62 = vector.broadcast %61 : vector<1x128xf32> to vector<4x128xf32>
    %63 = arith.mulf %60, %62 : vector<4x128xf32>
    %c119_i32 = arith.constant 119 : i32
    %64 = tpu.dynamic_rotate %35 by %c119_i32 dim 1 : vector<4x128xf32>, i32 -> vector<4x128xf32>
    %c23 = arith.constant 23 : index
    %c0_24 = arith.constant 0 : index
    %65 = vector.load %arg1[%c23, %c0_24] : memref<24x128xf32, #tpu.memory_space<vmem>>, vector<1x128xf32>
    %66 = vector.broadcast %65 : vector<1x128xf32> to vector<4x128xf32>
    %67 = arith.mulf %64, %66 : vector<4x128xf32>
    %cst_25 = arith.constant 0.000000e+00 : f32
    %68 = vector.broadcast %cst_25 : f32 to vector<4x128xf32>
    %69 = tpu.concatenate %39, %43, %47, %51, %35, %55, %59, %63, %67, %68 in 0 : vector<4x128xf32>, vector<4x128xf32>, vector<4x128xf32>, vector<4x128xf32>, vector<4x128xf32>, vector<4x128xf32>, vector<4x128xf32>, vector<4x128xf32>, vector<4x128xf32>, vector<4x128xf32> -> vector<40x128xf32>
    %cst_26 = arith.constant dense<0.000000e+00> : vector<4x128xf32>
    %70 = tpu.matmul %2, %69, %cst_26 {dimension_numbers = #tpu.dot_dimension_numbers<[1], [0], [0], [1], [0, 0, 1, 1], [], []>} : vector<4x40xf32>, vector<40x128xf32>, vector<4x128xf32> -> vector<4x128xf32>
    %71 = arith.mulf %70, %70 : vector<4x128xf32>
    %72 = tpu.concatenate %70, %71 in 0 : vector<4x128xf32>, vector<4x128xf32> -> vector<8x128xf32>
    %cst_27 = arith.constant dense<0.000000e+00> : vector<8xf32>
    %73 = vector.multi_reduction <add>, %72, %cst_27 [1] : vector<8x128xf32> to vector<8xf32>
    %74 = vector.shape_cast %73 : vector<8xf32> to vector<8x1xf32>
    %cst_28 = arith.constant 7.812500e-03 : f32
    %75 = vector.broadcast %cst_28 : f32 to vector<8x1xf32>
    %76 = arith.mulf %74, %75 : vector<8x1xf32>
    %77 = vector.extract_strided_slice %76 {offsets = [0, 0], sizes = [4, 1], strides = [1, 1]} : vector<8x1xf32> to vector<4x1xf32>
    %78 = vector.extract_strided_slice %76 {offsets = [4, 0], sizes = [4, 1], strides = [1, 1]} : vector<8x1xf32> to vector<4x1xf32>
    %79 = arith.mulf %77, %77 : vector<4x1xf32>
    %80 = arith.subf %78, %79 : vector<4x1xf32>
    %cst_29 = arith.constant 0.000000e+00 : f32
    %81 = vector.broadcast %cst_29 : f32 to vector<4x1xf32>
    %82 = arith.maximumf %80, %81 : vector<4x1xf32>
    %83 = vector.broadcast %77 : vector<4x1xf32> to vector<4x128xf32>
    %84 = arith.subf %70, %83 : vector<4x128xf32>
    %cst_30 = arith.constant 9.99999974E-6 : f32
    %85 = vector.broadcast %cst_30 : f32 to vector<4x1xf32>
    %86 = arith.addf %82, %85 : vector<4x1xf32>
    %87 = math.rsqrt %86 : vector<4x1xf32>
    %88 = vector.broadcast %87 : vector<4x1xf32> to vector<4x128xf32>
    %89 = arith.mulf %84, %88 : vector<4x128xf32>
    %90 = vector.broadcast %6 : vector<4x1xf32> to vector<4x128xf32>
    %91 = arith.mulf %89, %90 : vector<4x128xf32>
    %92 = vector.broadcast %7 : vector<4x1xf32> to vector<4x128xf32>
    %93 = arith.addf %91, %92 : vector<4x128xf32>
    %cst_31 = arith.constant 0.000000e+00 : f32
    %94 = vector.broadcast %cst_31 : f32 to vector<4x128xf32>
    %95 = arith.maximumf %93, %94 : vector<4x128xf32>
    %cst_32 = arith.constant dense<0.000000e+00> : vector<16x128xf32>
    %96 = tpu.matmul %3, %95, %cst_32 {dimension_numbers = #tpu.dot_dimension_numbers<[1], [0], [0], [1], [0, 0, 1, 1], [], []>} : vector<16x4xf32>, vector<4x128xf32>, vector<16x128xf32> -> vector<16x128xf32>
    %97 = arith.mulf %96, %96 : vector<16x128xf32>
    %98 = tpu.concatenate %96, %97 in 0 : vector<16x128xf32>, vector<16x128xf32> -> vector<32x128xf32>
    %cst_33 = arith.constant dense<0.000000e+00> : vector<32xf32>
    %99 = vector.multi_reduction <add>, %98, %cst_33 [1] : vector<32x128xf32> to vector<32xf32>
    %100 = vector.shape_cast %99 : vector<32xf32> to vector<32x1xf32>
    %cst_34 = arith.constant 7.812500e-03 : f32
    %101 = vector.broadcast %cst_34 : f32 to vector<32x1xf32>
    %102 = arith.mulf %100, %101 : vector<32x1xf32>
    %103 = vector.extract_strided_slice %102 {offsets = [0, 0], sizes = [16, 1], strides = [1, 1]} : vector<32x1xf32> to vector<16x1xf32>
    %104 = vector.extract_strided_slice %102 {offsets = [16, 0], sizes = [16, 1], strides = [1, 1]} : vector<32x1xf32> to vector<16x1xf32>
    %105 = arith.mulf %103, %103 : vector<16x1xf32>
    %106 = arith.subf %104, %105 : vector<16x1xf32>
    %cst_35 = arith.constant 0.000000e+00 : f32
    %107 = vector.broadcast %cst_35 : f32 to vector<16x1xf32>
    %108 = arith.maximumf %106, %107 : vector<16x1xf32>
    %109 = vector.broadcast %103 : vector<16x1xf32> to vector<16x128xf32>
    %110 = arith.subf %96, %109 : vector<16x128xf32>
    %cst_36 = arith.constant 9.99999974E-6 : f32
    %111 = vector.broadcast %cst_36 : f32 to vector<16x1xf32>
    %112 = arith.addf %108, %111 : vector<16x1xf32>
    %113 = math.rsqrt %112 : vector<16x1xf32>
    %114 = vector.broadcast %113 : vector<16x1xf32> to vector<16x128xf32>
    %115 = arith.mulf %110, %114 : vector<16x128xf32>
    %116 = vector.broadcast %8 : vector<16x1xf32> to vector<16x128xf32>
    %117 = arith.mulf %115, %116 : vector<16x128xf32>
    %118 = vector.broadcast %9 : vector<16x1xf32> to vector<16x128xf32>
    %119 = arith.addf %117, %118 : vector<16x128xf32>
    %120 = arith.addf %119, %0 : vector<16x128xf32>
    %cst_37 = arith.constant 0.000000e+00 : f32
    %121 = vector.broadcast %cst_37 : f32 to vector<16x128xf32>
    %122 = arith.maximumf %120, %121 : vector<16x128xf32>
    %c0_38 = arith.constant 0 : index
    %c0_39 = arith.constant 0 : index
    %123 = vector.load %arg2[%c0_38, %c0_39] : memref<16x128xf32, #tpu.memory_space<vmem>>, vector<16x128xf32>
    tpu.vector_store %arg2[%c0_38, %c0_39], %122 {strides = array<i32>} : memref<16x128xf32, #tpu.memory_space<vmem>>, vector<16x128xf32>,
    return
  }
}

</mosaic_0001>

<bundles_post_ra>
// kernel: bottleneck_block.1
= control target key start
LH: loop header
LB: loop body
LE: loop exit
PB: predicated region body
PF: predicated region fallthrough
CT: control target
= control target key end

     0   :  { %vm16_vm0 = vcmask 130048   ;;  %vm44_vm1 = vcmask 1043456   ;;  %v373_v7 = vmov 60   ;;  %v374_v8 = vmov 0   ;;  %s377_s15 = smov 120   ;;  %s378_s16 = smov 1   ;;  %s474_s0 = inlined_call_operand.vmem [shape: f32[16,128], index: 0, kind: input, shape index: {}]   ;;  %s475_s1 = inlined_call_operand.vmem [shape: f32[24,128], index: 1, kind: input, shape index: {}]   ;;  %s476_s2 = inlined_call_operand.vmem [shape: f32[16,128], index: 2, kind: output, shape index: {}]  }
   0x1   :  { %v408_v0 = vld [vmem:[%s474_s0 + $0x8] sm:$0xff]  ;;  %v413_v1 = vld [vmem:[%s474_s0] sm:$0xff]  ;;  %348 = vset.pattern.permute.xlu1 %v373_v7  ;;  %347 = vset.pattern.permute.xlu0 %v374_v8  ;;  %v375_v10 = vmov 61   ;;  %s376_s0 = smov 127   ;;  %s379_s17 = smov 119   ;;  %vm144_vm5 = vcmask 326656  }
   0x2   :  { %v418_v2 = vld [vmem:[%s475_s1] sm:$0xf]  ;;  %34 = vmatpush.msra.mxu0 %v408_v0  ;;  %s380_s18 = smov 7   ;;  %s381_s19 = smov 121   ;;  %v358_v34 = vld [vmem:[%s475_s1 + $0x17] ss:$0 sm:$0xff] }
   0x3   :  { %75 = vperm.xlu1 %348, %v418_v2   ;;  %s382_s20 = smov 112   ;;  %s383_s21 = smov 8   ;;  %v357_v36 = vld [vmem:[%s475_s1 + $0x16] ss:$0 sm:$0xff]  ;;  %v359_v39 = vld [vmem:[%s475_s1 + $0x15] ss:$0 sm:$0xff] }
   0x4   :  { %35 = vmatpush.msra.mxu0 %v413_v1  ;;  %s384_s22 = smov 9   ;;  %v360_v44 = vld [vmem:[%s475_s1 + $0x14] ss:$0 sm:$0xff]  ;;  %v362_v51 = vld [vmem:[%s475_s1 + $0x13] ss:$0 sm:$0xff]  ;;  %s386_s13 = smov 72  }
   0x5   :  { %324 = vmatmul.msk.f32.vlgmr.msra.gmra.mxu0 %vm16_vm0, %v418_v2  ;;  %v361_v52 = vld [vmem:[%s475_s1 + $0x11] ss:$0 sm:$0xff]  ;;  %v363_v54 = vld [vmem:[%s475_s1 + $0x10] ss:$0 sm:$0xff]  ;;  %v364_v55 = vld [vmem:[%s475_s1 + $0x12] ss:$0 sm:$0xff] }
   0x6   :  { %vm217_vm9 = vcmask 31744  }
   0xb   :  { %349 = vset.pattern.permute.xlu1 %v375_v10  ;;  %v385_v10 = vmov 62  }
   0xc   :  { %80 = vperm.xlu1 %349, %v418_v2  }
  0x14   :  { %350 = vset.pattern.permute.xlu1 %v385_v10 }
  0x75   :  { %v76_v24 = vpop.permute.xlu1 %75 }
  0x7e   :  { %v81_v29 = vpop.permute.xlu1 %80 }
  0x82   :  { %v37_v3 = vpop.f32.mrf.mxu0 }
  0x83   :  { %v40_v4 = vmul.f32 %v37_v3, %v37_v3 }
  0x85   :  { %v42_v5 = vrot.slane %v40_v4, 4 }
  0x87   :  { %v45_v6 = vsel %vm44_vm1, %v37_v3, %v42_v5 }
  0x88   :  { %46 = vadd.xlane.f32.xlu0 %v45_v6 }
  0xfb   :  { %v47_v9 = vpop.xlane.xlu0 %46 }
  0xfc   :  { %v48_v11 = vmul.f32 0.0078125, %v47_v9 }
  0xfe   :  { %v49_v12 = vmul.f32 %v48_v11, %v48_v11  ;;  %v55_v26 = vsub.f32 %v37_v3, %v48_v11 }
 0x100   :  { %v51_v13 = vrot.slane %v49_v12, 4 }
 0x102   :  { %v53_v14 = vsub.f32 %v48_v11, %v51_v13 }
 0x104   :  { %v54_v15 = vmax.f32 %v53_v14, 0.0 }
 0x106   :  { %v56_v16 = vadd.f32 1e-05, %v54_v15  ;;  %v14_v15 = vld [vmem:[%s475_s1] sm:$0xff] }
 0x108   :  { %365 = vrsqrt.f32 %v56_v16  ;;  %vm63_vm3 = vweird.f32 %v56_v16 }
 0x10e   :  { %v366_v17 = vpop.eup %365 }
 0x10f   :  { %v58_v18 = vmul.f32 %v366_v17, %v56_v16  ;;  %vm64_vm2 = vweird.f32 %v366_v17 }
 0x110   :  { %vm65_vm4 = vmor %vm63_vm3, %vm64_vm2 }
 0x111   :  { %v59_v19 = vmul.f32 %v366_v17, %v58_v18  ;;  %v15_v18 = vld [vmem:[%s475_s1 + $0x8] sm:$0xff] }
 0x113   :  { %v60_v20 = vmul.f32 0.5, %v59_v19 }
 0x115   :  { %v61_v21 = vsub.f32 1.5, %v60_v20 }
 0x117   :  { %v62_v22 = vmul.f32 %v366_v17, %v61_v21 }
 0x119   :  { %v66_v23 = vsel %vm65_vm4, %v366_v17, %v62_v22 }
 0x11a   :  { %69 = vperm.xlu0 %347, %v66_v23  }
 0x18c   :  { %v70_v25 = vpop.permute.xlu0 %69 }
 0x18d   :  { %v71_v27 = vrot.slane %v70_v25, 4 }
 0x18f   :  { %v73_v28 = vmul.f32 %v71_v27, %v55_v26  ;;  %v387_v26 = vmov 63   ;;  %v388_v27 = vmov 64  }
 0x190   :  { %352 = vset.pattern.permute.xlu2 %v388_v27 }
 0x191   :  { %v78_v30 = vmul.f32 %v76_v24, %v73_v28 }
 0x193   :  { %v83_v31 = vadd.f32 %v81_v29, %v78_v30 }
 0x195   :  { %v84_v32 = vmax.f32 %v83_v31, 0.0 }
 0x197   :  { %105 = vrot.lane.b32.xlu1 %v84_v32, %s376_s0  ;;  %115 = vrot.lane.b32.xlu2 %v84_v32, %s377_s15 }
 0x19f   :  { %100 = vrot.lane.b32.xlu1 %v84_v32, %s378_s16  ;;  %120 = vrot.lane.b32.xlu2 %v84_v32, %s379_s17 }
 0x1a7   :  { %95 = vrot.lane.b32.xlu1 %v84_v32, %s380_s18  ;;  %110 = vrot.lane.b32.xlu2 %v84_v32, %s381_s19 }
 0x1af   :  { %142 = vrot.lane.b32.xlu1 %v418_v2, %s382_s20  ;;  %90 = vrot.lane.b32.xlu2 %v84_v32, %s383_s21 }
 0x1b7   :  { %85 = vrot.lane.b32.xlu2 %v84_v32, %s384_s22  ;;  %201 = vperm.xlu1 %350, %v418_v2  }
 0x1bf   :  { %213 = vrot.lane.b32.xlu1 %v14_v15, %s386_s13 }
 0x1c7   :  { %215 = vrot.lane.b32.xlu1 %v15_v18, %s386_s13 }
 0x1f1   :  { %v116_v33 = vpop.permute.xlu2 %115 }
 0x1f2   :  { %v119_v38 = vmul.f32 %v357_v36, %v116_v33 }
 0x1f4   :  { %v135_v41 = vrot.slane %v119_v38, 4 }
 0x1f9   :  { %v121_v35 = vpop.permute.xlu2 %120 }
 0x1fa   :  { %v124_v37 = vmul.f32 %v358_v34, %v121_v35 }
 0x1fc   :  { %325 = vmatpush.msk.msra.mxu1 %vm44_vm1, %v124_v37 }
 0x201   :  { %v111_v40 = vpop.permute.xlu2 %110 }
 0x202   :  { %v114_v42 = vmul.f32 %v359_v39, %v111_v40 }
 0x204   :  { %v140_v43 = vsel %vm44_vm1, %v114_v42, %v135_v41 }
 0x205   :  { %159 = vmatpush.msra.mxu1 %v140_v43 }
 0x209   :  { %v106_v45 = vpop.permute.xlu1 %105  ;;  %v91_v48 = vpop.permute.xlu2 %90 }
 0x20a   :  { %v109_v46 = vmul.f32 %v360_v44, %v106_v45  ;;  %v94_v57 = vmul.f32 %v361_v52, %v91_v48 }
 0x20c   :  { %v132_v47 = vrot.slane %v109_v46, 4  ;;  %v126_v62 = vrot.slane %v94_v57, 4 }
 0x20e   :  { %v139_v49 = vsel %vm44_vm1, %v84_v32, %v132_v47 }
 0x20f   :  { %160 = vmatpush.msra.mxu1 %v139_v49 }
 0x211   :  { %v101_v50 = vpop.permute.xlu1 %100  ;;  %v86_v56 = vpop.permute.xlu2 %85 }
 0x212   :  { %v104_v53 = vmul.f32 %v362_v51, %v101_v50  ;;  %v89_v60 = vmul.f32 %v363_v54, %v86_v56 }
 0x214   :  { %v129_v59 = vrot.slane %v104_v53, 4  ;;  %v137_v3 = vsel %vm44_vm1, %v89_v60, %v126_v62 }
 0x219   :  { %v96_v58 = vpop.permute.xlu1 %95 }
 0x21a   :  { %v99_v61 = vmul.f32 %v364_v55, %v96_v58 }
 0x21c   :  { %v138_v63 = vsel %vm44_vm1, %v99_v61, %v129_v59 }
 0x21d   :  { %161 = vmatpush.msra.mxu1 %v138_v63 }
 0x21f   :  { %162 = vmatpush.msra.mxu1 %v137_v3 }
 0x221   :  { %v143_v4 = vpop.permute.xlu1 %142 }
 0x222   :  { %326 = vmatmul.msk.f32.vlgmr.msra.gmra.mxu1 %vm144_vm5, %v143_v4 }
 0x229   :  { %v202_v30 = vpop.permute.xlu1 %201 }
 0x231   :  { %v214_v36 = vpop.permute.xlu1 %213 }
 0x239   :  { %v216_v38 = vpop.permute.xlu1 %215 }
 0x29f   :  { %v164_v5 = vpop.f32.mrf.mxu1 }
 0x2a0   :  { %v167_v6 = vmul.f32 %v164_v5, %v164_v5 }
 0x2a2   :  { %v169_v7 = vrot.slane %v167_v6, 4 }
 0x2a4   :  { %v171_v8 = vsel %vm44_vm1, %v164_v5, %v169_v7 }
 0x2a5   :  { %172 = vadd.xlane.f32.xlu2 %v171_v8 }
 0x2bd   :  { %295 = vperm.xlu2 %352, %v14_v15  }
 0x318   :  { %v173_v9 = vpop.xlane.xlu2 %172 }
 0x319   :  { %v174_v11 = vmul.f32 0.0078125, %v173_v9 }
 0x31b   :  { %v175_v12 = vmul.f32 %v174_v11, %v174_v11  ;;  %v181_v31 = vsub.f32 %v164_v5, %v174_v11 }
 0x31d   :  { %v177_v13 = vrot.slane %v175_v12, 4 }
 0x31f   :  { %v179_v14 = vsub.f32 %v174_v11, %v177_v13 }
 0x320   :  { %v296_v43 = vpop.permute.xlu2 %295 }
 0x321   :  { %v180_v16 = vmax.f32 %v179_v14, 0.0 }
 0x323   :  { %v182_v17 = vadd.f32 1e-05, %v180_v16 }
 0x325   :  { %367 = vrsqrt.f32 %v182_v17  ;;  %vm189_vm7 = vweird.f32 %v182_v17 }
 0x32b   :  { %v368_v19 = vpop.eup %367 }
 0x32c   :  { %v184_v20 = vmul.f32 %v368_v19, %v182_v17  ;;  %vm190_vm6 = vweird.f32 %v368_v19 }
 0x32d   :  { %vm191_vm8 = vmor %vm189_vm7, %vm190_vm6 }
 0x32e   :  { %v185_v21 = vmul.f32 %v368_v19, %v184_v20 }
 0x330   :  { %v186_v22 = vmul.f32 0.5, %v185_v21 }
 0x332   :  { %v187_v23 = vsub.f32 1.5, %v186_v22 }
 0x334   :  { %v188_v24 = vmul.f32 %v368_v19, %v187_v23 }
 0x336   :  { %v192_v25 = vsel %vm191_vm8, %v368_v19, %v188_v24 }
 0x337   :  { %195 = vperm.xlu0 %347, %v192_v25  }
 0x33f   :  { %351 = vset.pattern.permute.xlu0 %v387_v26 }
 0x340   :  { %206 = vperm.xlu0 %351, %v418_v2   ;;  %v389_v2 = vmov 65  }
 0x341   :  { %354 = vset.pattern.permute.xlu1 %v389_v2  ;;  %355 = vset.pattern.permute.xlu2 %v389_v2 }
 0x348   :  { %353 = vset.pattern.permute.xlu0 %v388_v27 }
 0x3a9   :  { %v196_v28 = vpop.permute.xlu0 %195 }
 0x3aa   :  { %v197_v29 = vrot.slane %v196_v28, 4 }
 0x3ac   :  { %v199_v32 = vmul.f32 %v197_v29, %v181_v31 }
 0x3ae   :  { %v204_v33 = vmul.f32 %v202_v30, %v199_v32 }
 0x3b2   :  { %v207_v34 = vpop.permute.xlu0 %206 }
 0x3b3   :  { %v209_v35 = vadd.f32 %v207_v34, %v204_v33 }
 0x3b5   :  { %v210_v37 = vmax.f32 %v209_v35, 0.0 }
 0x3b7   :  { %327 = vmatpush.msk.msra.mxu2 %vm44_vm1, %v210_v37 }
 0x3b8   :  { %328 = vmatmul.msk.f32.vlgmr.msra.gmra.mxu2 %vm217_vm9, %v214_v36 }
 0x3c0   :  { %329 = vmatmul.msk.f32.gmra.mxu2 %vm217_vm9, %v216_v38 }
 0x43b   :  { %v242_v39 = vpop.f32.mrf.mxu2 }
 0x43c   :  { %250 = vadd.xlane.f32.xlu0 %v242_v39  ;;  %v248_v40 = vmul.f32 %v242_v39, %v242_v39 }
 0x43e   :  { %254 = vadd.xlane.f32.xlu2 %v248_v40 }
 0x443   :  { %v245_v41 = vpop.f32.mrf.mxu2 }
 0x444   :  { %252 = vadd.xlane.f32.xlu1 %v245_v41  ;;  %v249_v42 = vmul.f32 %v245_v41, %v245_v41 }
 0x446   :  { %256 = vadd.xlane.f32.xlu2 %v249_v42 }
 0x450   :  { %299 = vperm.xlu0 %353, %v15_v18  }
 0x458   :  { %356 = vset.pattern.permute.xlu0 %v389_v2 }
 0x45d   :  { %305 = vperm.xlu1 %354, %v14_v15  }
 0x45e   :  { %309 = vperm.xlu2 %355, %v15_v18  }
 0x4af   :  { %v251_v44 = vpop.xlane.xlu0 %250 }
 0x4b0   :  { %v258_v45 = vmul.f32 0.0078125, %v251_v44 }
 0x4b1   :  { %v255_v46 = vpop.xlane.xlu2 %254 }
 0x4b2   :  { %v262_v47 = vmul.f32 %v258_v45, %v258_v45  ;;  %v260_v48 = vmul.f32 0.0078125, %v255_v46  ;;  %v268_v6 = vsub.f32 %v242_v39, %v258_v45 }
 0x4b4   :  { %v264_v49 = vsub.f32 %v260_v48, %v262_v47 }
 0x4b6   :  { %v266_v50 = vmax.f32 %v264_v49, 0.0 }
 0x4b7   :  { %v253_v51 = vpop.xlane.xlu1 %252 }
 0x4b8   :  { %v270_v52 = vadd.f32 1e-05, %v266_v50  ;;  %v259_v53 = vmul.f32 0.0078125, %v253_v51 }
 0x4b9   :  { %v257_v54 = vpop.xlane.xlu2 %256 }
 0x4ba   :  { %369 = vrsqrt.f32 %v270_v52  ;;  %v263_v55 = vmul.f32 %v259_v53, %v259_v53  ;;  %v261_v56 = vmul.f32 0.0078125, %v257_v54  ;;  %vm278_vm11 = vweird.f32 %v270_v52 }
 0x4bb   :  { %v269_v18 = vsub.f32 %v245_v41, %v259_v53 }
 0x4bc   :  { %v265_v57 = vsub.f32 %v261_v56, %v263_v55 }
 0x4be   :  { %v267_v58 = vmax.f32 %v265_v57, 0.0 }
 0x4c0   :  { %v370_v59 = vpop.eup %369  ;;  %v271_v61 = vadd.f32 1e-05, %v267_v58 }
 0x4c1   :  { %v273_v60 = vmul.f32 %v370_v59, %v270_v52  ;;  %vm279_vm10 = vweird.f32 %v370_v59  ;;  %v310_v23 = vpop.permute.xlu2 %309 }
 0x4c2   :  { %371 = vrsqrt.f32 %v271_v61  ;;  %vm280_vm12 = vmor %vm278_vm11, %vm279_vm10  ;;  %vm288_vm14 = vweird.f32 %v271_v61  ;;  %v300_v20 = vpop.permute.xlu0 %299 }
 0x4c3   :  { %v274_v62 = vmul.f32 %v370_v59, %v273_v60 }
 0x4c5   :  { %v275_v63 = vmul.f32 0.5, %v274_v62 }
 0x4c7   :  { %v276_v3 = vsub.f32 1.5, %v275_v63 }
 0x4c8   :  { %v372_v4 = vpop.eup %371 }
 0x4c9   :  { %v277_v5 = vmul.f32 %v370_v59, %v276_v3  ;;  %v283_v7 = vmul.f32 %v372_v4, %v271_v61  ;;  %vm289_vm13 = vweird.f32 %v372_v4 }
 0x4ca   :  { %vm290_vm15 = vmor %vm288_vm14, %vm289_vm13 }
 0x4cb   :  { %v281_v8 = vsel %vm280_vm12, %v370_v59, %v277_v5  ;;  %v284_v9 = vmul.f32 %v372_v4, %v283_v7 }
 0x4cc   :  { %v292_v10 = vmul.f32 %v281_v8, %v268_v6 }
 0x4cd   :  { %v285_v12 = vmul.f32 0.5, %v284_v9 }
 0x4ce   :  { %v302_v11 = vmul.f32 %v296_v43, %v292_v10 }
 0x4cf   :  { %v306_v13 = vpop.permute.xlu1 %305  ;;  %v286_v15 = vsub.f32 1.5, %v285_v12 }
 0x4d0   :  { %v312_v14 = vadd.f32 %v306_v13, %v302_v11 }
 0x4d1   :  { %v287_v17 = vmul.f32 %v372_v4, %v286_v15 }
 0x4d2   :  { %v314_v16 = vadd.f32 %v312_v14, %v413_v1 }
 0x4d3   :  { %v291_v21 = vsel %vm290_vm15, %v372_v4, %v287_v17 }
 0x4d4   :  { %v316_v19 = vmax.f32 %v314_v16, 0.0  ;;  %v293_v22 = vmul.f32 %v291_v21, %v269_v18 }
 0x4d6   :  { %318 = vst [vmem:[%s476_s2] sm:$0xff] %v316_v19  ;;  %v303_v24 = vmul.f32 %v300_v20, %v293_v22 }
 0x4d8   :  { %v313_v25 = vadd.f32 %v310_v23, %v303_v24 }
 0x4da   :  { %v315_v26 = vadd.f32 %v313_v25, %v408_v0 }
 0x4dc   :  { %v317_v27 = vmax.f32 %v315_v26, 0.0 }
 0x4de   :  { %319 = vst [vmem:[%s476_s2 + $0x8] sm:$0xff] %v317_v27 }

</bundles_post_ra>
